<compile_context>
chip_gen: v7x
topology: tpu7x:2x2x1
jax: 0.10.0
libtpu: 0.0.40
codegen_flags: <defaults>
</compile_context>

<pallas_src>
import jax
import jax.numpy as jnp
from jax.experimental import pallas as pl
from jax.experimental.pallas import tpu as pltpu

_QK_LANES = 128   # zero-pad Cqk (= C // 8) up to a full 128-lane tile


def _chessboard_attn_kernel(gamma_ref, xs_ref, w_ref, b_ref, out_ref):
    G, N, C = xs_ref.shape
    w_all = w_ref.shape[1]
    qkp = (w_all - C) // 2                       # padded Q (and K) width

    x = xs_ref[...]                              # (G, N, C) f32
    x2 = x.reshape(G * N, C).astype(jnp.bfloat16)

    # Fused Q|K|V 1x1-conv projection: one (G*N, C) x (C, 2*qkp + C) MXU pass,
    # bf16 operands, f32 accumulation.  mask + 4x4 maxpool over a block that
    # is all zeros except the sampled pixel == relu of the sampled projection.
    # Padded Q/K columns have zero weight and zero bias, so they stay exactly
    # zero after the relu and leave the logits unchanged.
    proj = jnp.dot(x2, w_ref[...], preferred_element_type=jnp.float32)
    proj = jnp.maximum(proj + b_ref[...], 0.0)               # (G*N, w_all) f32

    # NOTE: these reshapes assume N = (H/4)*(W/4) is a multiple of 8 (sublane
    # tile); true for any H, W that are multiples of 4 with H*W/16 >= 8.
    q = proj[:, :qkp].astype(jnp.bfloat16).reshape(G, N, qkp)
    k = proj[:, qkp:2 * qkp].astype(jnp.bfloat16).reshape(G, N, qkp)
    v = proj[:, 2 * qkp:].astype(jnp.bfloat16).reshape(G, N, C)

    # attn[g, n, m] = softmax_m( q[g, n] . k[g, m] )   (batched dot_general
    # contracting the shared last axis -- no materialized transpose).
    logits = jnp.einsum('gnc,gmc->gnm', q, k,
                        preferred_element_type=jnp.float32)   # (G, N, N) f32
    logits = logits - jnp.max(logits, axis=-1, keepdims=True)
    e = jnp.exp(logits)
    l = jnp.sum(e, axis=-1, keepdims=True)                    # (G, N, 1) f32

    # out[g, n, c] = (sum_m e[g, n, m] * v[g, m, c]) / l[g, n]:
    # normalize the small (N, C) result instead of the (N, N) weights, with an
    # exact division (no approx reciprocal).
    acc = jnp.einsum('gnm,gmc->gnc', e.astype(jnp.bfloat16), v,
                     preferred_element_type=jnp.float32)      # (G, N, C) f32
    out = acc / l

    # Fused residual/scale: every pixel belongs to exactly one chessboard
    # slab, so gamma*out + x in NCHW is gamma*out_slab + x_slab here.
    out_ref[...] = gamma_ref[0] * out + x


def _vmem_capacity_bytes():
    """Physical VMEM per TensorCore; conservative fallback if unqueryable."""
    try:
        cap = int(getattr(pltpu.get_tpu_info(), "vmem_capacity_bytes", 0))
        if cap > 0:
            return cap
    except Exception:
        pass
    return 64 * 1024 * 1024          # v7x per-TC VMEM (smallest generation)


def _slabs_per_step(S, N, C, w_all, vmem_budget_bytes):
    """How many (batch, offset) slabs to process per grid step."""
    # f32-byte footprint per slab: double-buffered in/out blocks + f32/bf16
    # working copies (8*N*C), fused projection output + relu'd copy + bf16
    # q/k/v views (3*N*w_all), logits/e/transients (3*N*N).
    per_slab = 4 * (8 * N * C + 3 * N * w_all + 3 * N * N)
    g = max(1, min(S, vmem_budget_bytes // per_slab))
    # Keep >= 4 grid steps so BlockSpec double-buffering overlaps the slab
    # DMAs with compute and "parallel" can shard across v7x's 2 TensorCores.
    g = min(g, max(1, S // 4))
    while S % g:                     # keep the grid exact
        g -= 1
    return int(g)


def chessboard_attention(x, wq, bq, wk, bk, wv, bv, gamma):
    """x: (B, C, H, W) float32 NCHW with H, W divisible by 4."""
    B, C, H, W = x.shape
    assert H % 4 == 0 and W % 4 == 0
    Cqk = wq.shape[1]
    Hb, Wb = H // 4, W // 4
    N = Hb * Wb
    S = B * 16

    # Chessboard gather: (B, C, H, W) -> (S, N, C), slab s = b*16 + r*4 + c.
    xs = x.reshape(B, C, Hb, 4, Wb, 4).transpose(0, 3, 5, 2, 4, 1)
    xs = xs.reshape(S, N, C).astype(jnp.float32)

    # Fused Q|K|V weight (bf16 MXU operand).  Q and K are zero-padded to a
    # full 128-lane tile so the q/k/v slices land on lane-aligned offsets;
    # V keeps width C at offset 2*qkp.  Biases stay f32 (added post-matmul).
    qkp = max(_QK_LANES, -(-Cqk // _QK_LANES) * _QK_LANES)
    w_all = 2 * qkp + C
    w = jnp.zeros((C, w_all), jnp.float32)
    w = w.at[:, :Cqk].set(wq).at[:, qkp:qkp + Cqk].set(wk).at[:, 2 * qkp:].set(wv)
    w = w.astype(jnp.bfloat16)
    b = jnp.zeros((1, w_all), jnp.float32)
    b = b.at[0, :Cqk].set(bq).at[0, qkp:qkp + Cqk].set(bk).at[0, 2 * qkp:].set(bv)
    gamma1 = jnp.asarray(gamma, jnp.float32).reshape(1)

    vmem_cap = _vmem_capacity_bytes()
    G = _slabs_per_step(S, N, C, w_all,
                        vmem_budget_bytes=int(0.35 * vmem_cap))
    const = lambda i: (0, 0)

    out = pl.pallas_call(
        _chessboard_attn_kernel,
        out_shape=jax.ShapeDtypeStruct((S, N, C), jnp.float32),
        grid_spec=pltpu.PrefetchScalarGridSpec(
            num_scalar_prefetch=0,
            grid=(S // G,),
            in_specs=[
                pl.BlockSpec(memory_space=pltpu.MemorySpace.SMEM),   # gamma
                pl.BlockSpec((G, N, C), lambda i: (i, 0, 0)),        # xs slabs
                pl.BlockSpec((C, w_all), const),                     # Wq|Wk|Wv
                pl.BlockSpec((1, w_all), const),                     # bq|bk|bv
            ],
            out_specs=pl.BlockSpec((G, N, C), lambda i: (i, 0, 0)),
        ),
        input_output_aliases={1: 0},        # output reuses xs' HBM buffer
        compiler_params=pltpu.CompilerParams(
            dimension_semantics=("parallel",),
            vmem_limit_bytes=int(0.75 * vmem_cap)),
    )(gamma1, xs, w, b)

    # Scatter (S, N, C) back to NCHW: output pixel (i, j) comes from slab
    # num = (i%4)*4 + (j%4).  gamma*out + x was already applied in-kernel.
    out = out.reshape(B, 4, 4, Hb, Wb, C).transpose(0, 5, 3, 1, 4, 2)
    return out.reshape(B, C, H, W)


# ----------------------------------------------------------------------------
# References
# ----------------------------------------------------------------------------

def _reference_matched(x, wq, bq, wk, bk, wv, bv, gamma):
    """Pure-JAX reference replicating the kernel's mixed precision
    (bf16 MXU operands, f32 accumulation, f32 softmax, exact division)."""
    B, C, H, W = x.shape
    Hb, Wb = H // 4, W // 4
    N = Hb * Wb
    xs = x.reshape(B, C, Hb, 4, Wb, 4).transpose(0, 3, 5, 2, 4, 1)
    xs = xs.reshape(B * 16, N, C)
    xb = xs.astype(jnp.bfloat16)

    def proj(wm, bm):
        p = jnp.einsum('snc,cd->snd', xb, wm.astype(jnp.bfloat16),
                       preferred_element_type=jnp.float32)
        return jnp.maximum(p + bm, 0.0)

    q = proj(wq, bq).astype(jnp.bfloat16)
    k = proj(wk, bk).astype(jnp.bfloat16)
    v = proj(wv, bv).astype(jnp.bfloat16)
    logits = jnp.einsum('snd,smd->snm', q, k,
                        preferred_element_type=jnp.float32)
    logits = logits - jnp.max(logits, axis=-1, keepdims=True)
    e = jnp.exp(logits)
    l = jnp.sum(e, axis=-1, keepdims=True)
    acc = jnp.einsum('snm,smc->snc', e.astype(jnp.bfloat16), v,
                     preferred_element_type=jnp.float32)
    out = gamma * (acc / l) + xs
    out = out.reshape(B, 4, 4, Hb, Wb, C).transpose(0, 5, 3, 1, 4, 2)
    return out.reshape(B, C, H, W)


def _reference_f32(x, wq, bq, wk, bk, wv, bv, gamma):
    """Full-f32 pure-JAX reference mirroring the PyTorch forward exactly."""
    hi = jax.lax.Precision.HIGHEST
    B, C, H, W = x.shape
    Cqk = wq.shape[1]
    Hb, Wb = H // 4, W // 4
    pq = jnp.einsum('bchw,cd->bdhw', x, wq, precision=hi) + bq.reshape(1, Cqk, 1, 1)
    pk = jnp.einsum('bchw,cd->bdhw', x, wk, precision=hi) + bk.reshape(1, Cqk, 1, 1)
    pv = jnp.einsum('bchw,cd->bdhw', x, wv, precision=hi) + bv.reshape(1, C, 1, 1)
    out = jnp.zeros_like(x)
    for num in range(16):
        r, c = num // 4, num % 4
        # chessboard mask + 4x4 maxpool over an otherwise-zero block == relu
        q = jnp.maximum(pq[:, :, r::4, c::4], 0.0)
        k = jnp.maximum(pk[:, :, r::4, c::4], 0.0)
        v = jnp.maximum(pv[:, :, r::4, c::4], 0.0)
        qf = q.transpose(0, 2, 3, 1).reshape(B, Hb * Wb, Cqk)
        kf = k.reshape(B, Cqk, Hb * Wb)
        vf = v.reshape(B, C, Hb * Wb)
        attn = jax.nn.softmax(
            jnp.einsum('bnc,bcm->bnm', qf, kf, precision=hi), axis=-1)
        o = jnp.einsum('bcm,bnm->bcn', vf, attn,
                       precision=hi).reshape(B, C, Hb, Wb)
        out = out.at[:, :, r::4, c::4].set(o)
    return gamma * out + x


if __name__ == "__main__":
    B, C, H, W = 2, 32, 16, 16
    Cqk = C // 8

    key = jax.random.PRNGKey(0)
    kx, k1, k2, k3, k4, k5, k6 = jax.random.split(key, 7)

    x = jax.random.normal(kx, (B, C, H, W), dtype=jnp.float32)
    # 1x1 conv params (PyTorch weight shape (out, in, 1, 1) -> (in, out) here).
    wq = jax.random.normal(k1, (C, Cqk), dtype=jnp.float32) * 0.1
    bq = jax.random.normal(k2, (Cqk,), dtype=jnp.float32) * 0.1
    wk = jax.random.normal(k3, (C, Cqk), dtype=jnp.float32) * 0.1
    bk = jax.random.normal(k4, (Cqk,), dtype=jnp.float32) * 0.1
    wv = jax.random.normal(k5, (C, C), dtype=jnp.float32) * 0.1
    bv = jax.random.normal(k6, (C,), dtype=jnp.float32) * 0.1

    fn = jax.jit(chessboard_attention)

    # gamma = 0 (the module's init value, nn.Parameter(torch.zeros(1))):
    # output must be exactly x (0 * finite + x).
    y0 = jax.block_until_ready(fn(x, wq, bq, wk, bk, wv, bv, jnp.float32(0.0)))
    assert jnp.allclose(y0, x, atol=1e-6), "gamma=0 path should return x"

    # Nonzero gamma exercises the attention path.
    g = jnp.float32(0.7)
    y = jax.block_until_ready(fn(x, wq, bq, wk, bk, wv, bv, g))

    # (1) Tight check vs a pure-JAX reference with the SAME mixed precision
    #     (bf16 MXU operands, f32 accumulation): verifies the Pallas
    #     gather/scatter, fused projection and attention plumbing.
    y_ref_m = _reference_matched(x, wq, bq, wk, bk, wv, bv, g)
    assert jnp.allclose(y, y_ref_m, atol=2e-3, rtol=2e-3), \
        "mismatch vs precision-matched reference"

    # (2) Sanity check vs the full-f32, PyTorch-faithful reference; the slack
    #     covers the kernel's bf16 MXU rounding (~0.4% per operand).
    y_ref_f32 = _reference_f32(x, wq, bq, wk, bk, wv, bv, g)
    assert jnp.allclose(y, y_ref_f32, atol=3e-2, rtol=3e-2), \
        "mismatch vs f32 reference"

    print("KERNEL_OK")
</pallas_src>

<mosaic_0001>
module attributes {stable_mosaic.version = 11 : i64} {
  func.func @_chessboard_attn_kernel(%arg0: i32, %arg1: memref<1xf32, #tpu.memory_space<smem>>, %arg2: memref<8x16x32xf32, #tpu.memory_space<vmem>>, %arg3: memref<32x288xbf16, #tpu.memory_space<vmem>>, %arg4: memref<1x288xf32, #tpu.memory_space<vmem>>, %arg5: memref<8x16x32xf32, #tpu.memory_space<vmem>>) attributes {dimension_semantics = [#tpu.dimension_semantics<parallel>], iteration_bounds = array<i64: 4>, scalar_prefetch = 0 : i64, scratch_operands = 0 : i64, tpu.core_type = #tpu.core_type<tc>, window_params = [{transform_indices = @transform_0, window_bounds = array<i64: 1>}, {transform_indices = @transform_1, window_bounds = array<i64: 8, 16, 32>}, {pipeline_mode = #tpu.pipeline_mode<synchronous>, transform_indices = @transform_2, window_bounds = array<i64: 32, 288>}, {pipeline_mode = #tpu.pipeline_mode<synchronous>, transform_indices = @transform_3, window_bounds = array<i64: 1, 288>}, {transform_indices = @transform_4, window_bounds = array<i64: 8, 16, 32>}]} {
    %c0 = arith.constant 0 : index
    %c0_0 = arith.constant 0 : index
    %c0_1 = arith.constant 0 : index
    %0 = vector.load %arg2[%c0, %c0_0, %c0_1] : memref<8x16x32xf32, #tpu.memory_space<vmem>>, vector<8x16x32xf32>
    %1 = vector.shape_cast %0 : vector<8x16x32xf32> to vector<128x32xf32>
    %2 = arith.truncf %1 : vector<128x32xf32> to vector<128x32xbf16>
    %c0_2 = arith.constant 0 : index
    %c0_3 = arith.constant 0 : index
    %3 = vector.load %arg3[%c0_2, %c0_3] : memref<32x288xbf16, #tpu.memory_space<vmem>>, vector<32x288xbf16>
    %cst = arith.constant dense<0.000000e+00> : vector<128x288xf32>
    %4 = tpu.matmul %2, %3, %cst {dimension_numbers = #tpu.dot_dimension_numbers<[1], [0], [0], [1], [0, 0, 1, 1], [], []>} : vector<128x32xbf16>, vector<32x288xbf16>, vector<128x288xf32> -> vector<128x288xf32>
    %c0_4 = arith.constant 0 : index
    %c0_5 = arith.constant 0 : index
    %5 = vector.load %arg4[%c0_4, %c0_5] : memref<1x288xf32, #tpu.memory_space<vmem>>, vector<1x288xf32>
    %6 = vector.broadcast %5 : vector<1x288xf32> to vector<128x288xf32>
    %7 = arith.addf %4, %6 : vector<128x288xf32>
    %cst_6 = arith.constant 0.000000e+00 : f32
    %8 = vector.broadcast %cst_6 : f32 to vector<128x288xf32>
    %9 = arith.maximumf %7, %8 : vector<128x288xf32>
    %10 = vector.extract_strided_slice %9 {offsets = [0, 0], sizes = [128, 128], strides = [1, 1]} : vector<128x288xf32> to vector<128x128xf32>
    %11 = arith.truncf %10 : vector<128x128xf32> to vector<128x128xbf16>
    %12 = vector.shape_cast %11 : vector<128x128xbf16> to vector<8x16x128xbf16>
    %13 = vector.extract_strided_slice %9 {offsets = [0, 128], sizes = [128, 128], strides = [1, 1]} : vector<128x288xf32> to vector<128x128xf32>
    %14 = arith.truncf %13 : vector<128x128xf32> to vector<128x128xbf16>
    %15 = vector.shape_cast %14 : vector<128x128xbf16> to vector<8x16x128xbf16>
    %16 = vector.extract_strided_slice %9 {offsets = [0, 256], sizes = [128, 32], strides = [1, 1]} : vector<128x288xf32> to vector<128x32xf32>
    %17 = arith.truncf %16 : vector<128x32xf32> to vector<128x32xbf16>
    %18 = vector.shape_cast %17 : vector<128x32xbf16> to vector<8x16x32xbf16>
    "tpu.trace_start"() <{level = 10 : i32, message = "gnc,gmc->gnm"}> : () -> ()
    %cst_7 = arith.constant dense<0.000000e+00> : vector<8x16x16xf32>
    %19 = tpu.matmul %12, %15, %cst_7 {dimension_numbers = #tpu.dot_dimension_numbers<[2], [2], [1], [1], [0, 0, 0, 1, 1, 1], [0], [0]>} : vector<8x16x128xbf16>, vector<8x16x128xbf16>, vector<8x16x16xf32> -> vector<8x16x16xf32>
    "tpu.trace_stop"() : () -> ()
    %cst_8 = arith.constant dense<0xFF800000> : vector<8x16xf32>
    %20 = vector.multi_reduction <maximumf>, %19, %cst_8 [2] : vector<8x16x16xf32> to vector<8x16xf32>
    %21 = vector.shape_cast %20 : vector<8x16xf32> to vector<8x16x1xf32>
    %22 = vector.broadcast %21 : vector<8x16x1xf32> to vector<8x16x16xf32>
    %23 = arith.subf %19, %22 : vector<8x16x16xf32>
    %24 = math.exp %23 : vector<8x16x16xf32>
    %cst_9 = arith.constant dense<0.000000e+00> : vector<8x16xf32>
    %25 = vector.multi_reduction <add>, %24, %cst_9 [2] : vector<8x16x16xf32> to vector<8x16xf32>
    %26 = vector.shape_cast %25 : vector<8x16xf32> to vector<8x16x1xf32>
    %27 = arith.truncf %24 : vector<8x16x16xf32> to vector<8x16x16xbf16>
    "tpu.trace_start"() <{level = 10 : i32, message = "gnm,gmc->gnc"}> : () -> ()
    %cst_10 = arith.constant dense<0.000000e+00> : vector<8x16x32xf32>
    %28 = tpu.matmul %27, %18, %cst_10 {dimension_numbers = #tpu.dot_dimension_numbers<[2], [1], [1], [2], [0, 0, 0, 1, 1, 2], [0], [0]>} : vector<8x16x16xbf16>, vector<8x16x32xbf16>, vector<8x16x32xf32> -> vector<8x16x32xf32>
    "tpu.trace_stop"() : () -> ()
    %29 = vector.broadcast %26 : vector<8x16x1xf32> to vector<8x16x32xf32>
    %30 = arith.divf %28, %29 : vector<8x16x32xf32>
    %c0_11 = arith.constant 0 : index
    %31 = memref.load %arg1[%c0_11] : memref<1xf32, #tpu.memory_space<smem>>
    %32 = vector.broadcast %31 : f32 to vector<8x16x32xf32>
    %33 = arith.mulf %32, %30 : vector<8x16x32xf32>
    %34 = arith.addf %33, %0 : vector<8x16x32xf32>
    %c0_12 = arith.constant 0 : index
    %c0_13 = arith.constant 0 : index
    %c0_14 = arith.constant 0 : index
    %35 = vector.load %arg5[%c0_12, %c0_13, %c0_14] : memref<8x16x32xf32, #tpu.memory_space<vmem>>, vector<8x16x32xf32>
    tpu.vector_store %arg5[%c0_12, %c0_13, %c0_14], %34 {strides = array<i32>} : memref<8x16x32xf32, #tpu.memory_space<vmem>>, vector<8x16x32xf32>,
    return
  }
  func.func @transform_0(%arg0: i32) -> i32 {
    %c0_i32 = arith.constant 0 : i32
    %c0_i32_0 = arith.constant 0 : i32
    return %c0_i32 : i32
  }
  func.func @transform_1(%arg0: i32) -> (i32, i32, i32) {
    %c0_i32 = arith.constant 0 : i32
    %c0_i32_0 = arith.constant 0 : i32
    %c0_i32_1 = arith.constant 0 : i32
    return %arg0, %c0_i32, %c0_i32_0 : i32, i32, i32
  }
  func.func @transform_2(%arg0: i32) -> (i32, i32) {
    %c0_i32 = arith.constant 0 : i32
    %c0_i32_0 = arith.constant 0 : i32
    %c0_i32_1 = arith.constant 0 : i32
    return %c0_i32, %c0_i32_0 : i32, i32
  }
  func.func @transform_3(%arg0: i32) -> (i32, i32) {
    %c0_i32 = arith.constant 0 : i32
    %c0_i32_0 = arith.constant 0 : i32
    %c0_i32_1 = arith.constant 0 : i32
    return %c0_i32, %c0_i32_0 : i32, i32
  }
  func.func @transform_4(%arg0: i32) -> (i32, i32, i32) {
    %c0_i32 = arith.constant 0 : i32
    %c0_i32_0 = arith.constant 0 : i32
    %c0_i32_1 = arith.constant 0 : i32
    return %arg0, %c0_i32, %c0_i32_0 : i32, i32, i32
  }
}

</mosaic_0001>

<bundles_post_ra>
// kernel: chessboard_attention.1
= control target key start
LH: loop header
LB: loop body
LE: loop exit
PB: predicated region body
PF: predicated region fallthrough
CT: control target
= control target key end

     0   :  { %s1894_s17 = smov 0   ;;  %s2327_s0 = inlined_call_operand.<no memory space> [shape: f32[1], index: 0, kind: input, shape index: {}]   ;;  %s2328_s1 = inlined_call_operand.vmem [shape: f32[32,16,32], index: 1, kind: input, shape index: {}, may-alias: {1,4}]   ;;  %s2329_s2 = inlined_call_operand.vmem [shape: bf16[32,288], index: 2, kind: input, shape index: {}]   ;;  %s2330_s3 = inlined_call_operand.vmem [shape: f32[1,288], index: 3, kind: input, shape index: {}]   ;;  %s2331_s4 = inlined_call_operand.vmem [shape: f32[32,16,32], index: 4, kind: output, shape index: {}, may-alias: {1,4}]  }
   0x1   :  { %9 = sst [smem:[#allocation2]] %s2327_s0 }
   0x2 LB: > { %s1569_s18 = sadd.s32 4294967295, %s1861_s17   ;;  %p1573_p0 = scmp.ge.s32.totalorder %s1861_s17, 1  ;;  %s1861_s17 = sphi %s1894_s17, %s15_s17  }
   0x3   : > { %p165_p1 = scmp.lt.s32.totalorder %s1861_s17, 5 }
   0x5   : > { %p166_p2 = pnand %p1573_p0, %p165_p1 }
   0x6   : > { %v1783_v0 = vld [vmem:[%s2329_s2 + $0x4] ss:$12 sps:$4 sm:$0xff] (!%p166_p2)   ;;  %s1574_s0 = sshll.u32 (!%p166_p2), %s1569_s18, 3  ;;  %v1785_v1 = vld [vmem:[%s2329_s2] ss:$12 sps:$4 sm:$0xff] (!%p166_p2)   ;;  %v1863_v2 = vmov (!%p166_p2), 0   ;;  %v242_v32 = vlaneseq (!%p166_p2) }
   0x7   : > { %169 = sbr.rel (%p166_p2) target bundleno = 899 (0x383), region = 36  ;;  %346 = vmatprep.mubr.bf16.mxu0 (!%p166_p2), %v1863_v2  ;;  %p194_p3 = scmp.lt.s32.totalorder (!%p166_p2), %s1574_s0, 31  ;;  %314 = vmatprep.subr.bf16.mxu0 (!%p166_p2), %v1783_v0  ;;  %v1786_v3 = vld [vmem:[%s2329_s2 + $0x1c] ss:$12 sps:$4 sm:$0xff] (!%p166_p2)   ;;  %v1788_v4 = vld [vmem:[%s2329_s2 + $0x18] ss:$12 sps:$4 sm:$0xff] (!%p166_p2)  }
   0x8   : > { %315 = vmatpush1.bf16.msra.mxu0 (!%p166_p2), %v1785_v1  ;;  %v1789_v5 = vld [vmem:[%s2329_s2 + $0x8] ss:$12 sps:$4 sm:$0xff] (!%p166_p2)   ;;  %v1790_v6 = vld [vmem:[%s2329_s2 + $0x20] ss:$12 sps:$4 sm:$0xff] (!%p166_p2)   ;;  %vm289_vm0 = vcmask (!%p166_p2), 261120   ;;  %v1864_v31 = vmov (!%p166_p2), 0.0  }
   0x9   : > { %316 = vmatprep.subr.bf16.mxu0 (!%p166_p2), %v1786_v3  ;;  %1656 = vmatprep.subr.bf16.mxu1 (!%p166_p2), %v1789_v5  ;;  %vm1865_vm1 = vmmov (!%p166_p2), 0   ;;  %v243_v33 = vshrl.u32 (!%p166_p2), %v242_v32, 7  ;;  %v240_v35 = vld [vmem:[%s2330_s3] sm:$0x7] (!%p166_p2)  ;;  %vm924_vm2 = vcmask (!%p166_p2), 130048   ;;  %s1461_s11 = sld [smem:[#allocation2]] (!%p166_p2) }
   0xa   : > { %1657 = vmatpush3.bf16.msra.mxu1 (!%p166_p2), %v1789_v5 }
   0xb   : > { %1658 = vmatprep.subr.bf16.mxu1 (!%p166_p2), %v1790_v6  ;;  %v244_v34 = vsub.s32 (!%p166_p2), 0, %v243_v33  ;;  %v248_v36 = vsub.s32 (!%p166_p2), 1, %v243_v33  ;;  %v252_v37 = vsub.s32 (!%p166_p2), 2, %v243_v33 }
   0xc   : > { %317 = vmatpush1.bf16.msra.mxu0 (!%p166_p2), %v1788_v4 }
   0xd   : > { %1700 = vmatprep.subr.bf16.mxu0 (!%p166_p2), %v1864_v31  ;;  %v2027_v38 = vrot.slane (!%p166_p2), %v240_v35, %v244_v34  ;;  %v2029_v39 = vrot.slane (!%p166_p2), %v240_v35, %v248_v36  ;;  %v2031_v41 = vrot.slane (!%p166_p2), %v240_v35, %v252_v37 }
   0xe   : > { %s2333_s0 = smov (!%p194_p3, %s1574_s0), 31  ;;  %1659 = vmatpush3.bf16.msra.mxu1 %v1790_v6 }
   0xf   : > { %s1612_s5 = sshll.u32 %s2333_s0, 4  ;;  %1676 = vmatprep.subr.bf16.mxu1 %v1864_v31 }
  0x10   : > { %s1929_s8 = scalar_lea.vmem %s2328_s1, %s1612_s5  ;;  %s2259_s14 = scalar_lea.vmem %s2331_s4, %s1612_s5 }
  0x11   : > { %v1932_v7 = vld [vmem:[%s1929_s8] sm:$0xff]  ;;  %v1935_v8 = vld [vmem:[%s1929_s8 + $0x8] sm:$0xff]  ;;  %v1940_v10 = vld [vmem:[%s1929_s8 + $0x10] sm:$0xff] }
  0x12   : > { %v224_v9 = vpack.c.bf16 %v1935_v8, %v1932_v7  ;;  %v1943_v11 = vld [vmem:[%s1929_s8 + $0x18] sm:$0xff]  ;;  %v1946_v12 = vld [vmem:[%s1929_s8 + $0x20] sm:$0xff]  ;;  %v1949_v13 = vld [vmem:[%s1929_s8 + $0x28] sm:$0xff] }
  0x13   : > { %v225_v14 = vpack.c.bf16 %v1943_v11, %v1940_v10  ;;  %v226_v15 = vpack.c.bf16 %v1949_v13, %v1946_v12  ;;  %v1961_v16 = vld [vmem:[%s1929_s8 + $0x30] sm:$0xff]  ;;  %v1964_v17 = vld [vmem:[%s1929_s8 + $0x38] sm:$0xff]  ;;  %v1967_v18 = vld [vmem:[%s1929_s8 + $0x40] sm:$0xff] }
  0x14   : > { %1586 = vmatmul.mubr.msk.bf16.vlgmr.msra.gmra.mrb[0].mxu0 %vm289_vm0, %v224_v9  ;;  %1660 = vmatprep.mubr.msk.bf16.mxu1 %vm289_vm0, %v224_v9  ;;  %v1970_v19 = vld [vmem:[%s1929_s8 + $0x48] sm:$0xff]  ;;  %v227_v20 = vpack.c.bf16 %v1964_v17, %v1961_v16  ;;  %v1981_v22 = vld [vmem:[%s1929_s8 + $0x50] sm:$0xff]  ;;  %v1984_v23 = vld [vmem:[%s1929_s8 + $0x58] sm:$0xff] }
  0x15   : > { %356 = vmatprep.mubr.bf16.mxu0 %v1863_v2  ;;  %1661 = vmatmul.mubr.msk.bf16.vlgmr.msra.gmra.mrb[0].mxu1 %vm289_vm0, %v225_v14  ;;  %v228_v21 = vpack.c.bf16 %v1970_v19, %v1967_v18  ;;  %v1987_v24 = vld [vmem:[%s1929_s8 + $0x60] sm:$0xff]  ;;  %v1990_v25 = vld [vmem:[%s1929_s8 + $0x68] sm:$0xff]  ;;  %v229_v26 = vpack.c.bf16 %v1984_v23, %v1981_v22  ;;  %v2001_v28 = vld [vmem:[%s1929_s8 + $0x70] sm:$0xff] }
  0x16   : > { %1664 = vmatprep.mubr.msk.bf16.mxu1 %vm289_vm0, %v226_v15  ;;  %v230_v27 = vpack.c.bf16 %v1990_v25, %v1987_v24  ;;  %v2004_v29 = vld [vmem:[%s1929_s8 + $0x78] sm:$0xff] }
  0x17   : > { %v231_v30 = vpack.c.bf16 %v2004_v29, %v2001_v28 }
  0x1c   : > { %1587 = vmatmul.mubr.msk.bf16.gmra.mrb[4].mxu0 %vm289_vm0, %v225_v14 }
  0x1d   : > { %366 = vmatprep.mubr.bf16.mxu0 %v1863_v2  ;;  %1665 = vmatmul.mubr.msk.bf16.gmra.mrb[4].mxu1 %vm289_vm0, %v227_v20 }
  0x1e   : > { %1668 = vmatprep.mubr.msk.bf16.mxu1 %vm289_vm0, %v228_v21 }
  0x24   : > { %1588 = vmatmul.mubr.msk.bf16.gmra.mrb[8].mxu0 %vm289_vm0, %v226_v15 }
  0x25   : > { %376 = vmatprep.mubr.bf16.mxu0 %v1863_v2  ;;  %1669 = vmatmul.mubr.msk.bf16.gmra.mrb[8].mxu1 %vm289_vm0, %v229_v26 }
  0x26   : > { %1672 = vmatprep.mubr.msk.bf16.mxu1 %vm289_vm0, %v230_v27 }
  0x2c   : > { %1589 = vmatmul.mubr.msk.bf16.gmra.mrb[12].mxu0 %vm289_vm0, %v227_v20 }
  0x2d   : > { %386 = vmatprep.mubr.bf16.mxu0 %v1863_v2  ;;  %1673 = vmatmul.mubr.msk.bf16.gmra.mrb[12].mxu1 %vm289_vm0, %v231_v30 }
  0x2e   : > { %1678 = vmatprep.mubr.msk.bf16.mxu1 %vm1865_vm1, %v1864_v31 }
  0x34   : > { %1590 = vmatmul.mubr.msk.bf16.gmra.mrb[16].mxu0 %vm289_vm0, %v228_v21 }
  0x35   : > { %396 = vmatprep.mubr.bf16.mxu0 %v1863_v2 }
  0x3c   : > { %1591 = vmatmul.mubr.msk.bf16.gmra.mrb[20].mxu0 %vm289_vm0, %v229_v26 }
  0x3d   : > { %406 = vmatprep.mubr.bf16.mxu0 %v1863_v2 }
  0x44   : > { %1592 = vmatmul.mubr.msk.bf16.gmra.mrb[24].mxu0 %vm289_vm0, %v230_v27 }
  0x45   : > { %416 = vmatprep.mubr.bf16.mxu0 %v1863_v2 }
  0x4c   : > { %1593 = vmatmul.mubr.msk.bf16.gmra.mrb[28].mxu0 %vm289_vm0, %v231_v30 }
  0x4d   : > { %1702 = vmatprep.mubr.msk.bf16.mxu0 %vm1865_vm1, %v1864_v31 }
  0xe7   : > { %v348_v40 = vpop.f32.mrb[0].mxu0 }
  0xe8   : > { %v349_v42 = vadd.f32 %v348_v40, %v2027_v38  ;;  %v350_v43 = vpop.f32.mrb[1].mxu0  ;;  %v1662_v48 = vpop.f32.mrb[0].mxu1 }
  0xe9   : > { %v351_v44 = vadd.f32 %v350_v43, %v2029_v39  ;;  %v352_v45 = vpop.f32.mrb[2].mxu0  ;;  %v470_v50 = vadd.f32 %v1662_v48, %v2031_v41  ;;  %v461_v51 = vpop.f32.mrb[1].mxu1 }
  0xea   : > { %v353_v46 = vadd.f32 %v352_v45, %v2027_v38  ;;  %v354_v47 = vpop.f32.mrb[3].mxu0  ;;  %v524_v52 = vmax.f32 %v349_v42, 0.0  ;;  %v462_v54 = vadd.f32 %v461_v51, %v2031_v41  ;;  %v1663_v55 = vpop.f32.mrb[2].mxu1 }
  0xeb   : > { %v355_v49 = vadd.f32 %v354_v47, %v2029_v39  ;;  %v525_v56 = vmax.f32 %v351_v44, 0.0  ;;  %v532_v58 = vmax.f32 %v470_v50, 0.0  ;;  %v473_v59 = vadd.f32 %v1663_v55, %v2031_v41  ;;  %v464_v60 = vpop.f32.mrb[3].mxu1 }
  0xec   : > { %v527_v53 = vmax.f32 %v353_v46, 0.0  ;;  %v526_v62 = vmax.f32 %v462_v54, 0.0  ;;  %v465_v63 = vadd.f32 %v464_v60, %v2031_v41 }
  0xed   : > { %v528_v57 = vmax.f32 %v355_v49, 0.0  ;;  %v535_v2 = vmax.f32 %v473_v59, 0.0 }
  0xee   : > { %v572_v61 = vpack.c.bf16 %v527_v53, %v524_v52  ;;  %v529_v5 = vmax.f32 %v465_v63, 0.0 }
  0xef   : > { %v580_v0 = vpack.c.bf16 %v528_v57, %v525_v56  ;;  %v358_v1 = vpop.f32.mrb[4].mxu0  ;;  %v2043_v14 = vpack.c.bf16 %v535_v2, %v532_v58 }
  0xf0   : > { %v359_v3 = vadd.f32 %v358_v1, %v2027_v38  ;;  %v360_v4 = vpop.f32.mrb[5].mxu0  ;;  %v2047_v21 = vpack.c.bf16 %v529_v5, %v526_v62  ;;  %v1666_v26 = vpop.f32.mrb[4].mxu1 }
  0xf1   : > { %v361_v6 = vadd.f32 %v360_v4, %v2029_v39  ;;  %v362_v9 = vpop.f32.mrb[6].mxu0  ;;  %1677 = vmatpush3.bf16.xpose.msra.mxu1 %v580_v0  ;;  %v486_v30 = vadd.f32 %v1666_v26, %v2031_v41  ;;  %v477_v32 = vpop.f32.mrb[5].mxu1 }
  0xf2   : > { %v363_v15 = vadd.f32 %v362_v9, %v2027_v38  ;;  %v364_v20 = vpop.f32.mrb[7].mxu0  ;;  %1682 = vmatprep.subr.bf16.mxu1 %v1864_v31  ;;  %v530_v33 = vmax.f32 %v359_v3, 0.0  ;;  %v478_v35 = vadd.f32 %v477_v32, %v2031_v41  ;;  %v1667_v36 = vpop.f32.mrb[6].mxu1 }
  0xf3   : > { %v365_v27 = vadd.f32 %v364_v20, %v2029_v39  ;;  %v531_v37 = vmax.f32 %v361_v6, 0.0  ;;  %v544_v42 = vmax.f32 %v486_v30, 0.0  ;;  %v489_v43 = vadd.f32 %v1667_v36, %v2031_v41  ;;  %v480_v44 = vpop.f32.mrb[7].mxu1 }
  0xf4   : > { %v533_v34 = vmax.f32 %v363_v15, 0.0  ;;  %v538_v46 = vmax.f32 %v478_v35, 0.0  ;;  %v481_v47 = vadd.f32 %v480_v44, %v2031_v41 }
  0xf5   : > { %v534_v40 = vmax.f32 %v365_v27, 0.0  ;;  %v547_v50 = vmax.f32 %v489_v43, 0.0 }
  0xf6   : > { %v573_v45 = vpack.c.bf16 %v533_v34, %v530_v33  ;;  %v541_v53 = vmax.f32 %v481_v47, 0.0 }
  0xf7   : > { %v581_v48 = vpack.c.bf16 %v534_v40, %v531_v37  ;;  %v368_v49 = vpop.f32.mrb[8].mxu0  ;;  %v2058_v56 = vpack.c.bf16 %v547_v50, %v544_v42 }
  0xf8   : > { %v369_v51 = vadd.f32 %v368_v49, %v2027_v38  ;;  %v370_v52 = vpop.f32.mrb[9].mxu0  ;;  %1679 = vmatmul.mubr.bf16.vlgmr.msra.gmra.mrb[16].mxu1 %v572_v61  ;;  %v2062_v59 = vpack.c.bf16 %v541_v53, %v538_v46  ;;  %v1670_v60 = vpop.f32.mrb[8].mxu1 }
  0xf9   : > { %v371_v54 = vadd.f32 %v370_v52, %v2029_v39  ;;  %v372_v55 = vpop.f32.mrb[10].mxu0  ;;  %1683 = vmatpush3.bf16.xpose.msra.mxu1 %v581_v48  ;;  %1684 = vmatprep.mubr.msk.bf16.mxu1 %vm1865_vm1, %v1864_v31  ;;  %v502_v62 = vadd.f32 %v1670_v60, %v2031_v41  ;;  %v493_v63 = vpop.f32.mrb[9].mxu1 }
  0xfa   : > { %v373_v57 = vadd.f32 %v372_v55, %v2027_v38  ;;  %v374_v58 = vpop.f32.mrb[11].mxu0  ;;  %1688 = vmatprep.subr.bf16.mxu1 %v1864_v31  ;;  %v536_v0 = vmax.f32 %v369_v51, 0.0  ;;  %v494_v2 = vadd.f32 %v493_v63, %v2031_v41  ;;  %v1671_v3 = vpop.f32.mrb[10].mxu1 }
  0xfb   : > { %v375_v61 = vadd.f32 %v374_v58, %v2029_v39  ;;  %v537_v4 = vmax.f32 %v371_v54, 0.0  ;;  %v556_v6 = vmax.f32 %v502_v62, 0.0  ;;  %v505_v9 = vadd.f32 %v1671_v3, %v2031_v41  ;;  %v496_v15 = vpop.f32.mrb[11].mxu1 }
  0xfc   : > { %v539_v1 = vmax.f32 %v373_v57, 0.0  ;;  %v550_v26 = vmax.f32 %v494_v2, 0.0  ;;  %v497_v27 = vadd.f32 %v496_v15, %v2031_v41 }
  0xfd   : > { %v540_v5 = vmax.f32 %v375_v61, 0.0  ;;  %v559_v33 = vmax.f32 %v505_v9, 0.0 }
  0xfe   : > { %v574_v20 = vpack.c.bf16 %v539_v1, %v536_v0  ;;  %v553_v36 = vmax.f32 %v497_v27, 0.0 }
  0xff   : > { %v582_v30 = vpack.c.bf16 %v540_v5, %v537_v4  ;;  %v378_v32 = vpop.f32.mrb[12].mxu0  ;;  %v2073_v42 = vpack.c.bf16 %v559_v33, %v556_v6 }
 0x100   : > { %v379_v34 = vadd.f32 %v378_v32, %v2027_v38  ;;  %v380_v35 = vpop.f32.mrb[13].mxu0  ;;  %1685 = vmatmul.mubr.bf16.vlgmr.msra.gmra.mrb[20].mxu1 %v573_v45  ;;  %v2077_v46 = vpack.c.bf16 %v553_v36, %v550_v26  ;;  %v1674_v47 = vpop.f32.mrb[12].mxu1 }
 0x101   : > { %v381_v37 = vadd.f32 %v380_v35, %v2029_v39  ;;  %v382_v40 = vpop.f32.mrb[14].mxu0  ;;  %1689 = vmatpush3.bf16.xpose.msra.mxu1 %v582_v30  ;;  %1690 = vmatprep.mubr.msk.bf16.mxu1 %vm1865_vm1, %v1864_v31  ;;  %v518_v48 = vadd.f32 %v1674_v47, %v2031_v41  ;;  %v509_v49 = vpop.f32.mrb[13].mxu1 }
 0x102   : > { %v383_v43 = vadd.f32 %v382_v40, %v2027_v38  ;;  %v384_v44 = vpop.f32.mrb[15].mxu0  ;;  %1694 = vmatprep.subr.bf16.mxu1 %v1864_v31  ;;  %v542_v50 = vmax.f32 %v379_v34, 0.0  ;;  %v510_v52 = vadd.f32 %v509_v49, %v2031_v41  ;;  %v1675_v53 = vpop.f32.mrb[14].mxu1 }
 0x103   : > { %v385_v45 = vadd.f32 %v384_v44, %v2029_v39  ;;  %v543_v54 = vmax.f32 %v381_v37, 0.0  ;;  %v568_v57 = vmax.f32 %v518_v48, 0.0  ;;  %v521_v58 = vadd.f32 %v1675_v53, %v2031_v41  ;;  %v512_v60 = vpop.f32.mrb[15].mxu1 }
 0x104   : > { %v545_v51 = vmax.f32 %v383_v43, 0.0  ;;  %v562_v62 = vmax.f32 %v510_v52, 0.0  ;;  %v513_v63 = vadd.f32 %v512_v60, %v2031_v41 }
 0x105   : > { %v546_v55 = vmax.f32 %v385_v45, 0.0  ;;  %v571_v2 = vmax.f32 %v521_v58, 0.0 }
 0x106   : > { %v575_v61 = vpack.c.bf16 %v545_v51, %v542_v50  ;;  %v565_v5 = vmax.f32 %v513_v63, 0.0 }
 0x107   : > { %v583_v0 = vpack.c.bf16 %v546_v55, %v543_v54  ;;  %v388_v1 = vpop.f32.mrb[16].mxu0  ;;  %v2088_v15 = vpack.c.bf16 %v571_v2, %v568_v57 }
 0x108   : > { %v389_v3 = vadd.f32 %v388_v1, %v2027_v38  ;;  %v390_v4 = vpop.f32.mrb[17].mxu0  ;;  %1691 = vmatmul.mubr.bf16.vlgmr.msra.gmra.mrb[24].mxu1 %v574_v20  ;;  %v2092_v27 = vpack.c.bf16 %v565_v5, %v562_v62 }
 0x109   : > { %v391_v6 = vadd.f32 %v390_v4, %v2029_v39  ;;  %v392_v9 = vpop.f32.mrb[18].mxu0  ;;  %1695 = vmatpush3.bf16.xpose.msra.mxu1 %v583_v0  ;;  %1696 = vmatprep.mubr.msk.bf16.mxu1 %vm1865_vm1, %v1864_v31 }
 0x10a   : > { %v393_v26 = vadd.f32 %v392_v9, %v2027_v38  ;;  %v394_v41 = vpop.f32.mrb[19].mxu0  ;;  %1706 = vmatprep.subr.bf16.mxu1 %v1864_v31  ;;  %v548_v20 = vmax.f32 %v389_v3, 0.0 }
 0x10b   : > { %v395_v30 = vadd.f32 %v394_v41, %v2029_v39  ;;  %v549_v33 = vmax.f32 %v391_v6, 0.0 }
 0x10c   : > { %v551_v32 = vmax.f32 %v393_v26, 0.0 }
 0x10d   : > { %v552_v34 = vmax.f32 %v395_v30, 0.0 }
 0x10e   : > { %v576_v35 = vpack.c.bf16 %v551_v32, %v548_v20 }
 0x10f   : > { %v584_v36 = vpack.c.bf16 %v552_v34, %v549_v33  ;;  %v398_v37 = vpop.f32.mrb[20].mxu0 }
 0x110   : > { %v399_v40 = vadd.f32 %v398_v37, %v2027_v38  ;;  %v400_v43 = vpop.f32.mrb[21].mxu0  ;;  %1697 = vmatmul.mubr.bf16.vlgmr.msra.gmra.mrb[28].mxu1 %v575_v61 }
 0x111   : > { %v401_v44 = vadd.f32 %v400_v43, %v2029_v39  ;;  %v402_v47 = vpop.f32.mrb[22].mxu0  ;;  %1701 = vmatpush3.bf16.xpose.msra.mxu0 %v584_v36  ;;  %1708 = vmatprep.mubr.msk.bf16.mxu1 %vm1865_vm1, %v1864_v31 }
 0x112   : > { %v403_v45 = vadd.f32 %v402_v47, %v2027_v38  ;;  %v404_v48 = vpop.f32.mrb[23].mxu0  ;;  %1712 = vmatprep.subr.bf16.mxu0 %v1864_v31  ;;  %v554_v50 = vmax.f32 %v399_v40, 0.0 }
 0x113   : > { %v405_v49 = vadd.f32 %v404_v48, %v2029_v39  ;;  %v555_v52 = vmax.f32 %v401_v44, 0.0 }
 0x114   : > { %v557_v51 = vmax.f32 %v403_v45, 0.0 }
 0x115   : > { %v558_v53 = vmax.f32 %v405_v49, 0.0 }
 0x116   : > { %v577_v54 = vpack.c.bf16 %v557_v51, %v554_v50 }
 0x117   : > { %v585_v55 = vpack.c.bf16 %v558_v53, %v555_v52  ;;  %v408_v57 = vpop.f32.mrb[24].mxu0 }
 0x118   : > { %v409_v58 = vadd.f32 %v408_v57, %v2027_v38  ;;  %v410_v60 = vpop.f32.mrb[25].mxu0  ;;  %1703 = vmatmul.mubr.bf16.vlgmr.msra.gmra.mrb[32].mxu0 %v576_v35 }
 0x119   : > { %v411_v61 = vadd.f32 %v410_v60, %v2029_v39  ;;  %v412_v62 = vpop.f32.mrb[26].mxu0  ;;  %1707 = vmatpush3.bf16.xpose.msra.mxu1 %v585_v55  ;;  %1714 = vmatprep.mubr.msk.bf16.mxu0 %vm1865_vm1, %v1864_v31 }
 0x11a   : > { %v413_v63 = vadd.f32 %v412_v62, %v2027_v38  ;;  %v414_v0 = vpop.f32.mrb[27].mxu0  ;;  %1718 = vmatprep.subr.bf16.mxu1 %v1864_v31  ;;  %v560_v2 = vmax.f32 %v409_v58, 0.0 }
 0x11b   : > { %v415_v1 = vadd.f32 %v414_v0, %v2029_v39  ;;  %v561_v4 = vmax.f32 %v411_v61, 0.0 }
 0x11c   : > { %v563_v3 = vmax.f32 %v413_v63, 0.0 }
 0x11d   : > { %v564_v5 = vmax.f32 %v415_v1, 0.0 }
 0x11e   : > { %v578_v6 = vpack.c.bf16 %v563_v3, %v560_v2 }
 0x11f   : > { %v586_v9 = vpack.c.bf16 %v564_v5, %v561_v4  ;;  %v418_v26 = vpop.f32.mrb[28].mxu0 }
 0x120   : > { %v419_v41 = vadd.f32 %v418_v26, %v2027_v38  ;;  %v420_v30 = vpop.f32.mrb[29].mxu0  ;;  %1709 = vmatmul.mubr.bf16.vlgmr.msra.gmra.mrb[32].mxu1 %v577_v54 }
 0x121   : > { %v421_v20 = vadd.f32 %v420_v30, %v2029_v39  ;;  %v422_v32 = vpop.f32.mrb[30].mxu0  ;;  %1713 = vmatpush3.bf16.xpose.msra.mxu0 %v586_v9  ;;  %1720 = vmatprep.mubr.msk.bf16.mxu1 %vm1865_vm1, %v1864_v31 }
 0x122   : > { %v423_v33 = vadd.f32 %v422_v32, %v2027_v38  ;;  %v424_v34 = vpop.f32.mrb[31].mxu0  ;;  %1724 = vmatprep.subr.bf16.mxu0 %v1864_v31  ;;  %v566_v36 = vmax.f32 %v419_v41, 0.0 }
 0x123   : > { %v425_v35 = vadd.f32 %v424_v34, %v2029_v39  ;;  %v567_v40 = vmax.f32 %v421_v20, 0.0 }
 0x124   : > { %v569_v37 = vmax.f32 %v423_v33, 0.0 }
 0x125   : > { %v570_v43 = vmax.f32 %v425_v35, 0.0 }
 0x126   : > { %v579_v44 = vpack.c.bf16 %v569_v37, %v566_v36 }
 0x127   : > { %v587_v47 = vpack.c.bf16 %v570_v43, %v567_v40 }
 0x128   : > { %1715 = vmatmul.mubr.bf16.vlgmr.msra.gmra.mrb[36].mxu0 %v578_v6 }
 0x129   : > { %1719 = vmatpush3.bf16.xpose.msra.mxu1 %v587_v47  ;;  %1725 = vmatpush3.bf16.msra.mxu0 %v2047_v21 }
 0x12a   : > { %1730 = vmatprep.subr.bf16.mxu1 %v1864_v31  ;;  %1726 = vmatprep.mubr.msk.bf16.mxu0 %vm1865_vm1, %v1864_v31 }
 0x12b   : > { %1736 = vmatprep.subr.bf16.mxu0 %v1864_v31 }
 0x130   : > { %1721 = vmatmul.mubr.bf16.vlgmr.msra.gmra.mrb[36].mxu1 %v579_v44 }
 0x131   : > { %1731 = vmatpush3.bf16.msra.mxu1 %v2043_v14  ;;  %1732 = vmatprep.mubr.msk.bf16.mxu1 %vm1865_vm1, %v1864_v31 }
 0x132   : > { %1742 = vmatprep.subr.bf16.mxu1 %v1864_v31 }
 0x1cb   : > { %v2125_v38 = vpop.f32.mrb[16].mxu1 }
 0x1cc   : > { %v1680_v39 = vpop.f32.mrb[17].mxu1  ;;  %v925_v21 = vsel %vm924_vm2, %v2125_v38, -inf }
 0x1cd   : > { %926 = vmax.xlane.f32.xlu0 %v925_v21  ;;  %v2129_v45 = vpop.f32.mrb[18].mxu1 }
 0x1ce   : > { %v1681_v48 = vpop.f32.mrb[19].mxu1  ;;  %v928_v49 = vsel %vm924_vm2, %v2129_v45, -inf }
 0x1d1   : > { %929 = vmax.xlane.f32.xlu0 %v928_v49 }
 0x1d3   : > { %v2133_v14 = vpop.f32.mrb[20].mxu1 }
 0x1d4   : > { %v1686_v50 = vpop.f32.mrb[21].mxu1  ;;  %v931_v51 = vsel %vm924_vm2, %v2133_v14, -inf }
 0x1d5   : > { %932 = vmax.xlane.f32.xlu1 %v931_v51  ;;  %v2137_v52 = vpop.f32.mrb[22].mxu1 }
 0x1d6   : > { %v1687_v53 = vpop.f32.mrb[23].mxu1  ;;  %v934_v54 = vsel %vm924_vm2, %v2137_v52, -inf }
 0x1d9   : > { %935 = vmax.xlane.f32.xlu1 %v934_v54 }
 0x1db   : > { %v2141_v55 = vpop.f32.mrb[24].mxu1 }
 0x1dc   : > { %v1692_v57 = vpop.f32.mrb[25].mxu1  ;;  %v937_v58 = vsel %vm924_vm2, %v2141_v55, -inf }
 0x1dd   : > { %938 = vmax.xlane.f32.xlu0 %v937_v58  ;;  %v2145_v60 = vpop.f32.mrb[26].mxu1 }
 0x1de   : > { %v1693_v61 = vpop.f32.mrb[27].mxu1  ;;  %v940_v62 = vsel %vm924_vm2, %v2145_v60, -inf }
 0x1df   : > { %941 = vmax.xlane.f32.xlu1 %v940_v62 }
 0x1e3   : > { %v2149_v63 = vpop.f32.mrb[28].mxu1 }
 0x1e4   : > { %v1698_v0 = vpop.f32.mrb[29].mxu1  ;;  %v943_v1 = vsel %vm924_vm2, %v2149_v63, -inf }
 0x1e5   : > { %944 = vmax.xlane.f32.xlu0 %v943_v1  ;;  %v2153_v2 = vpop.f32.mrb[30].mxu1 }
 0x1e6   : > { %v1699_v3 = vpop.f32.mrb[31].mxu1  ;;  %v946_v4 = vsel %vm924_vm2, %v2153_v2, -inf }
 0x1e7   : > { %947 = vmax.xlane.f32.xlu1 %v946_v4 }
 0x1eb   : > { %v2157_v5 = vpop.f32.mrb[32].mxu0 }
 0x1ec   : > { %v1704_v6 = vpop.f32.mrb[33].mxu0  ;;  %v949_v9 = vsel %vm924_vm2, %v2157_v5, -inf }
 0x1ed   : > { %v2161_v26 = vpop.f32.mrb[34].mxu0  ;;  %950 = vmax.xlane.f32.xlu0 %v949_v9 }
 0x1ee   : > { %v1705_v41 = vpop.f32.mrb[35].mxu0  ;;  %v952_v30 = vsel %vm924_vm2, %v2161_v26, -inf }
 0x1ef   : > { %953 = vmax.xlane.f32.xlu1 %v952_v30 }
 0x1f3   : > { %v2165_v20 = vpop.f32.mrb[32].mxu1 }
 0x1f4   : > { %v1710_v32 = vpop.f32.mrb[33].mxu1  ;;  %v955_v33 = vsel %vm924_vm2, %v2165_v20, -inf }
 0x1f5   : > { %956 = vmax.xlane.f32.xlu0 %v955_v33  ;;  %v2169_v34 = vpop.f32.mrb[34].mxu1 }
 0x1f6   : > { %v958_v35 = vsel %vm924_vm2, %v2169_v34, -inf  ;;  %v1711_v36 = vpop.f32.mrb[35].mxu1 }
 0x1f7   : > { %959 = vmax.xlane.f32.xlu1 %v958_v35 }
 0x1fb   : > { %v2173_v37 = vpop.f32.mrb[36].mxu0 }
 0x1fc   : > { %v1716_v40 = vpop.f32.mrb[37].mxu0  ;;  %v961_v43 = vsel %vm924_vm2, %v2173_v37, -inf }
 0x1fd   : > { %v2177_v44 = vpop.f32.mrb[38].mxu0  ;;  %962 = vmax.xlane.f32.xlu0 %v961_v43 }
 0x1fe   : > { %v964_v47 = vsel %vm924_vm2, %v2177_v44, -inf  ;;  %v1717_v39 = vpop.f32.mrb[39].mxu0 }
 0x1ff   : > { %965 = vmax.xlane.f32.xlu1 %v964_v47 }
 0x203   : > { %v2181_v21 = vpop.f32.mrb[36].mxu1 }
 0x204   : > { %v1722_v48 = vpop.f32.mrb[37].mxu1  ;;  %v967_v49 = vsel %vm924_vm2, %v2181_v21, -inf }
 0x205   : > { %968 = vmax.xlane.f32.xlu0 %v967_v49  ;;  %v2185_v50 = vpop.f32.mrb[38].mxu1 }
 0x206   : > { %v970_v51 = vsel %vm924_vm2, %v2185_v50, -inf  ;;  %v1723_v53 = vpop.f32.mrb[39].mxu1 }
 0x207   : > { %971 = vmax.xlane.f32.xlu1 %v970_v51 }
 0x25a   : > { %v927_v54 = vpop.xlane.xlu0 %926 }
 0x25b   : > { %v973_v57 = vsub.f32 %v2125_v38, %v927_v54 }
 0x25d   : > { %v989_v58 = vmul.f32 1.442695, %v973_v57 }
 0x25e   : > { %v930_v61 = vpop.xlane.xlu0 %929 }
 0x25f   : > { %1791 = vpow2.f32 %v989_v58  ;;  %v974_v62 = vsub.f32 %v2129_v45, %v930_v61 }
 0x261   : > { %v991_v0 = vmul.f32 1.442695, %v974_v62 }
 0x262   : > { %v933_v1 = vpop.xlane.xlu1 %932 }
 0x263   : > { %1793 = vpow2.f32 %v991_v0  ;;  %v975_v3 = vsub.f32 %v2133_v14, %v933_v1 }
 0x265   : > { %v993_v4 = vmul.f32 1.442695, %v975_v3 }
 0x266   : > { %v936_v6 = vpop.xlane.xlu1 %935 }
 0x267   : > { %1795 = vpow2.f32 %v993_v4  ;;  %v976_v9 = vsub.f32 %v2137_v52, %v936_v6 }
 0x269   : > { %v1792_v41 = vpop.eup %1791  ;;  %v995_v30 = vmul.f32 1.442695, %v976_v9 }
 0x26a   : > { %v939_v32 = vpop.xlane.xlu0 %938  ;;  %v1021_v38 = vsel %vm924_vm2, %v1792_v41, 0.0 }
 0x26b   : > { %1797 = vpow2.f32 %v995_v30  ;;  %v977_v33 = vsub.f32 %v2141_v55, %v939_v32  ;;  %1022 = vadd.xlane.f32.xlu0 %v1021_v38 }
 0x26c   : > { %v942_v45 = vpop.xlane.xlu1 %941 }
 0x26d   : > { %v1794_v35 = vpop.eup %1793  ;;  %v997_v36 = vmul.f32 1.442695, %v977_v33  ;;  %v978_v40 = vsub.f32 %v2145_v60, %v942_v45 }
 0x26e   : > { %v1024_v14 = vsel %vm924_vm2, %v1794_v35, 0.0  ;;  %v1069_v43 = vpack.c.bf16 %v1794_v35, %v1792_v41 }
 0x26f   : > { %1799 = vpow2.f32 %v997_v36  ;;  %v999_v47 = vmul.f32 1.442695, %v978_v40  ;;  %1025 = vadd.xlane.f32.xlu1 %v1024_v14 }
 0x270   : > { %1727 = vmatmul.mubr.msk.bf16.vlgmr.msra.gmra.mrb[40].mxu0 %vm924_vm2, %v1069_v43 }
 0x271   : > { %v1796_v52 = vpop.eup %1795  ;;  %1801 = vpow2.f32 %v999_v47  ;;  %1737 = vmatpush3.bf16.msra.mxu0 %v2062_v59  ;;  %1738 = vmatprep.mubr.msk.bf16.mxu0 %vm1865_vm1, %v1864_v31 }
 0x272   : > { %v945_v55 = vpop.xlane.xlu0 %944  ;;  %v1027_v39 = vsel %vm924_vm2, %v1796_v52, 0.0  ;;  %1748 = vmatprep.subr.bf16.mxu0 %v1864_v31 }
 0x273   : > { %v979_v60 = vsub.f32 %v2149_v63, %v945_v55  ;;  %1028 = vadd.xlane.f32.xlu0 %v1027_v39 }
 0x274   : > { %v948_v48 = vpop.xlane.xlu1 %947 }
 0x275   : > { %v1798_v49 = vpop.eup %1797  ;;  %v1001_v51 = vmul.f32 1.442695, %v979_v60  ;;  %v980_v53 = vsub.f32 %v2153_v2, %v948_v48 }
 0x276   : > { %v1030_v54 = vsel %vm924_vm2, %v1798_v49, 0.0  ;;  %v1070_v57 = vpack.c.bf16 %v1798_v49, %v1796_v52 }
 0x277   : > { %1803 = vpow2.f32 %v1001_v51  ;;  %v1003_v59 = vmul.f32 1.442695, %v980_v53  ;;  %1031 = vadd.xlane.f32.xlu1 %v1030_v54 }
 0x278   : > { %1733 = vmatmul.mubr.msk.bf16.vlgmr.msra.gmra.mrb[40].mxu1 %vm924_vm2, %v1070_v57 }
 0x279   : > { %v1800_v58 = vpop.eup %1799  ;;  %1805 = vpow2.f32 %v1003_v59  ;;  %1743 = vmatpush3.bf16.msra.mxu1 %v2058_v56  ;;  %1744 = vmatprep.mubr.msk.bf16.mxu1 %vm1865_vm1, %v1864_v31 }
 0x27a   : > { %v951_v63 = vpop.xlane.xlu0 %950  ;;  %v1033_v61 = vsel %vm924_vm2, %v1800_v58, 0.0  ;;  %1754 = vmatprep.subr.bf16.mxu1 %v1864_v31 }
 0x27b   : > { %v1802_v2 = vpop.eup %1801  ;;  %v981_v62 = vsub.f32 %v2157_v5, %v951_v63  ;;  %1034 = vadd.xlane.f32.xlu0 %v1033_v61 }
 0x27c   : > { %v954_v0 = vpop.xlane.xlu1 %953  ;;  %v1036_v1 = vsel %vm924_vm2, %v1802_v2, 0.0  ;;  %v1071_v3 = vpack.c.bf16 %v1802_v2, %v1800_v58 }
 0x27d   : > { %v1005_v4 = vmul.f32 1.442695, %v981_v62  ;;  %v982_v6 = vsub.f32 %v2161_v26, %v954_v0  ;;  %1037 = vadd.xlane.f32.xlu1 %v1036_v1 }
 0x27e   : > { %1739 = vmatmul.mubr.msk.bf16.vlgmr.msra.gmra.mrb[44].mxu0 %vm924_vm2, %v1071_v3 }
 0x27f   : > { %1807 = vpow2.f32 %v1005_v4  ;;  %v1007_v56 = vmul.f32 1.442695, %v982_v6  ;;  %1749 = vmatpush3.bf16.msra.mxu0 %v2077_v46  ;;  %1750 = vmatprep.mubr.msk.bf16.mxu0 %vm1865_vm1, %v1864_v31 }
 0x280   : > { %1760 = vmatprep.subr.bf16.mxu0 %v1864_v31 }
 0x281   : > { %v1804_v5 = vpop.eup %1803  ;;  %1809 = vpow2.f32 %v1007_v56 }
 0x282   : > { %v957_v9 = vpop.xlane.xlu0 %956  ;;  %v1039_v41 = vsel %vm924_vm2, %v1804_v5, 0.0 }
 0x283   : > { %v1806_v30 = vpop.eup %1805  ;;  %v983_v26 = vsub.f32 %v2165_v20, %v957_v9  ;;  %1040 = vadd.xlane.f32.xlu0 %v1039_v41  ;;  %v2251_v9 = vstv %s1461_s11 }
 0x284   : > { %v960_v32 = vpop.xlane.xlu1 %959  ;;  %v1042_v38 = vsel %vm924_vm2, %v1806_v30, 0.0  ;;  %v1072_v33 = vpack.c.bf16 %v1806_v30, %v1804_v5 }
 0x285   : > { %v1009_v45 = vmul.f32 1.442695, %v983_v26  ;;  %v984_v46 = vsub.f32 %v2169_v34, %v960_v32  ;;  %1043 = vadd.xlane.f32.xlu1 %v1042_v38 }
 0x286   : > { %1745 = vmatmul.mubr.msk.bf16.vlgmr.msra.gmra.mrb[44].mxu1 %vm924_vm2, %v1072_v33 }
 0x287   : > { %1811 = vpow2.f32 %v1009_v45  ;;  %v1011_v35 = vmul.f32 1.442695, %v984_v46  ;;  %1755 = vmatpush3.bf16.msra.mxu1 %v2073_v42  ;;  %1756 = vmatprep.mubr.msk.bf16.mxu1 %vm1865_vm1, %v1864_v31 }
 0x288   : > { %1766 = vmatprep.subr.bf16.mxu1 %v1864_v31 }
 0x289   : > { %v1808_v20 = vpop.eup %1807  ;;  %1813 = vpow2.f32 %v1011_v35 }
 0x28a   : > { %v963_v36 = vpop.xlane.xlu0 %962  ;;  %v1045_v40 = vsel %vm924_vm2, %v1808_v20, 0.0 }
 0x28b   : > { %v1810_v14 = vpop.eup %1809  ;;  %v985_v34 = vsub.f32 %v2173_v37, %v963_v36  ;;  %1046 = vadd.xlane.f32.xlu0 %v1045_v40 }
 0x28c   : > { %v966_v43 = vpop.xlane.xlu1 %965  ;;  %v1048_v47 = vsel %vm924_vm2, %v1810_v14, 0.0  ;;  %v1073_v52 = vpack.c.bf16 %v1810_v14, %v1808_v20 }
 0x28d   : > { %v1013_v55 = vmul.f32 1.442695, %v985_v34  ;;  %v986_v42 = vsub.f32 %v2177_v44, %v966_v43  ;;  %1049 = vadd.xlane.f32.xlu1 %v1048_v47 }
 0x28e   : > { %1751 = vmatmul.mubr.msk.bf16.vlgmr.msra.gmra.mrb[48].mxu0 %vm924_vm2, %v1073_v52 }
 0x28f   : > { %1815 = vpow2.f32 %v1013_v55  ;;  %v1015_v39 = vmul.f32 1.442695, %v986_v42  ;;  %1761 = vmatpush3.bf16.msra.mxu0 %v2092_v27  ;;  %1762 = vmatprep.mubr.msk.bf16.mxu0 %vm1865_vm1, %v1864_v31 }
 0x291   : > { %v1812_v60 = vpop.eup %1811  ;;  %1817 = vpow2.f32 %v1015_v39 }
 0x292   : > { %v969_v37 = vpop.xlane.xlu0 %968  ;;  %v1051_v48 = vsel %vm924_vm2, %v1812_v60, 0.0 }
 0x293   : > { %v1814_v49 = vpop.eup %1813  ;;  %v987_v51 = vsub.f32 %v2181_v21, %v969_v37  ;;  %1052 = vadd.xlane.f32.xlu0 %v1051_v48 }
 0x294   : > { %v972_v44 = vpop.xlane.xlu1 %971  ;;  %v1054_v53 = vsel %vm924_vm2, %v1814_v49, 0.0  ;;  %v1074_v54 = vpack.c.bf16 %v1814_v49, %v1812_v60 }
 0x295   : > { %v1017_v57 = vmul.f32 1.442695, %v987_v51  ;;  %v988_v59 = vsub.f32 %v2185_v50, %v972_v44  ;;  %1055 = vadd.xlane.f32.xlu1 %v1054_v53 }
 0x296   : > { %1757 = vmatmul.mubr.msk.bf16.vlgmr.msra.gmra.mrb[48].mxu1 %vm924_vm2, %v1074_v54 }
 0x297   : > { %1819 = vpow2.f32 %v1017_v57  ;;  %v1019_v27 = vmul.f32 1.442695, %v988_v59  ;;  %1767 = vmatpush3.bf16.msra.mxu1 %v2088_v15  ;;  %1768 = vmatprep.mubr.msk.bf16.mxu1 %vm1865_vm1, %v1864_v31 }
 0x299   : > { %v1816_v58 = vpop.eup %1815  ;;  %1821 = vpow2.f32 %v1019_v27 }
 0x29a   : > { %v1057_v21 = vsel %vm924_vm2, %v1816_v58, 0.0 }
 0x29b   : > { %v1818_v63 = vpop.eup %1817  ;;  %1058 = vadd.xlane.f32.xlu0 %v1057_v21 }
 0x29c   : > { %v1060_v61 = vsel %vm924_vm2, %v1818_v63, 0.0  ;;  %v1075_v2 = vpack.c.bf16 %v1818_v63, %v1816_v58 }
 0x29d   : > { %1061 = vadd.xlane.f32.xlu1 %v1060_v61 }
 0x29e   : > { %1763 = vmatmul.mubr.msk.bf16.vlgmr.msra.gmra.mrb[52].mxu0 %vm924_vm2, %v1075_v2 }
 0x2a1   : > { %v1820_v50 = vpop.eup %1819 }
 0x2a2   : > { %v1063_v62 = vsel %vm924_vm2, %v1820_v50, 0.0 }
 0x2a3   : > { %v1822_v0 = vpop.eup %1821  ;;  %1064 = vadd.xlane.f32.xlu0 %v1063_v62 }
 0x2a4   : > { %v1066_v15 = vsel %vm924_vm2, %v1822_v0, 0.0  ;;  %v1076_v31 = vpack.c.bf16 %v1822_v0, %v1820_v50 }
 0x2a5   : > { %1067 = vadd.xlane.f32.xlu1 %v1066_v15 }
 0x2a6   : > { %1769 = vmatmul.mubr.msk.bf16.vlgmr.msra.gmra.mrb[52].mxu1 %vm924_vm2, %v1076_v31 }
 0x2f8   : > { %v1023_v1 = vpop.xlane.xlu0 %1022 }
 0x2f9   : > { %1823 = vrcp.f32 %v1023_v1 }
 0x2fc   : > { %v1026_v3 = vpop.xlane.xlu1 %1025 }
 0x2fd   : > { %1825 = vrcp.f32 %v1026_v3 }
 0x300   : > { %v1029_v4 = vpop.xlane.xlu0 %1028 }
 0x301   : > { %1827 = vrcp.f32 %v1029_v4 }
 0x303   : > { %v1824_v56 = vpop.eup %1823 }
 0x304   : > { %v1032_v6 = vpop.xlane.xlu1 %1031 }
 0x305   : > { %1829 = vrcp.f32 %v1032_v6 }
 0x307   : > { %v1826_v32 = vpop.eup %1825 }
 0x308   : > { %v1035_v41 = vpop.xlane.xlu0 %1034 }
 0x309   : > { %1831 = vrcp.f32 %v1035_v41 }
 0x30a   : > { %v1038_v33 = vpop.xlane.xlu1 %1037 }
 0x30b   : > { %1833 = vrcp.f32 %v1038_v33  ;;  %v1828_v14 = vpop.eup %1827 }
 0x30f   : > { %v1830_v55 = vpop.eup %1829 }
 0x310   : > { %v1041_v43 = vpop.xlane.xlu0 %1040 }
 0x311   : > { %1835 = vrcp.f32 %v1041_v43 }
 0x312   : > { %v1044_v39 = vpop.xlane.xlu1 %1043 }
 0x313   : > { %v1832_v49 = vpop.eup %1831  ;;  %1837 = vrcp.f32 %v1044_v39 }
 0x315   : > { %v1834_v57 = vpop.eup %1833 }
 0x318   : > { %v1047_v27 = vpop.xlane.xlu0 %1046 }
 0x319   : > { %1839 = vrcp.f32 %v1047_v27 }
 0x31a   : > { %v1050_v63 = vpop.xlane.xlu1 %1049 }
 0x31b   : > { %v1836_v50 = vpop.eup %1835  ;;  %1841 = vrcp.f32 %v1050_v63 }
 0x31d   : > { %v1838_v31 = vpop.eup %1837 }
 0x320   : > { %v1053_v3 = vpop.xlane.xlu0 %1052 }
 0x321   : > { %1843 = vrcp.f32 %v1053_v3 }
 0x343   : > { %v1114_v5 = vpop.f32.mrb[40].mxu0 }
 0x344   : > { %v1430_v30 = vmul.f32 %v1824_v56, %v1114_v5  ;;  %v1728_v26 = vpop.f32.mrb[41].mxu0  ;;  %v1056_v56 = vpop.xlane.xlu1 %1055 }
 0x345   : > { %v1117_v38 = vpop.f32.mrb[42].mxu0  ;;  %1845 = vrcp.f32 %v1056_v56 }
 0x346   : > { %v1463_v45 = vmul.f32 %v2251_v9, %v1430_v30  ;;  %v1432_v46 = vmul.f32 %v1826_v32, %v1117_v38  ;;  %v1729_v35 = vpop.f32.mrb[43].mxu0  ;;  %v1840_v30 = vpop.eup %1839 }
 0x347   : > { %v1842_v33 = vpop.eup %1841 }
 0x348   : > { %v1479_v20 = vadd.f32 %v1463_v45, %v1932_v7  ;;  %v1464_v36 = vmul.f32 %v2251_v9, %v1432_v46  ;;  %v1059_v46 = vpop.xlane.xlu0 %1058 }
 0x349   : > { %1847 = vrcp.f32 %v1059_v46 }
 0x34a   : > { %1495 = vst.msk [vmem:[%s2259_s14] sm:$0xff] %vm289_vm0, %v1479_v20  ;;  %v1480_v40 = vadd.f32 %v1464_v36, %v1935_v8  ;;  %v1062_v36 = vpop.xlane.xlu1 %1061 }
 0x34b   : > { %v1158_v34 = vpop.f32.mrb[40].mxu1  ;;  %1849 = vrcp.f32 %v1062_v36 }
 0x34c   : > { %1496 = vst.msk [vmem:[%s2259_s14 + $0x8] sm:$0xff] %vm289_vm0, %v1480_v40  ;;  %v1434_v47 = vmul.f32 %v1828_v14, %v1158_v34  ;;  %v1734_v52 = vpop.f32.mrb[41].mxu1  ;;  %v1844_v34 = vpop.eup %1843 }
 0x34d   : > { %v1161_v42 = vpop.f32.mrb[42].mxu1  ;;  %v1065_v39 = vpop.xlane.xlu0 %1064 }
 0x34e   : > { %v1465_v7 = vmul.f32 %v2251_v9, %v1434_v47  ;;  %v1436_v60 = vmul.f32 %v1830_v55, %v1161_v42  ;;  %v1735_v37 = vpop.f32.mrb[43].mxu1  ;;  %1851 = vrcp.f32 %v1065_v39 }
 0x34f   : > { %v1846_v55 = vpop.eup %1845  ;;  %v1068_v37 = vpop.xlane.xlu1 %1067 }
 0x350   : > { %v1481_v48 = vadd.f32 %v1465_v7, %v1940_v10  ;;  %v1466_v8 = vmul.f32 %v2251_v9, %v1436_v60  ;;  %1853 = vrcp.f32 %v1068_v37 }
 0x351   : > { %v1202_v51 = vpop.f32.mrb[44].mxu0 }
 0x352   : > { %1497 = vst.msk [vmem:[%s2259_s14 + $0x10] sm:$0xff] %vm289_vm0, %v1481_v48  ;;  %v1482_v44 = vadd.f32 %v1466_v8, %v1943_v11  ;;  %v1438_v53 = vmul.f32 %v1832_v49, %v1202_v51  ;;  %v1740_v54 = vpop.f32.mrb[45].mxu0 }
 0x353   : > { %v1205_v59 = vpop.f32.mrb[46].mxu0  ;;  %v1848_v49 = vpop.eup %1847 }
 0x354   : > { %1498 = vst.msk [vmem:[%s2259_s14 + $0x18] sm:$0xff] %vm289_vm0, %v1482_v44  ;;  %v1467_v10 = vmul.f32 %v2251_v9, %v1438_v53  ;;  %v1440_v58 = vmul.f32 %v1834_v57, %v1205_v59  ;;  %v1741_v21 = vpop.f32.mrb[47].mxu0 }
 0x355   : > { %v1850_v54 = vpop.eup %1849 }
 0x356   : > { %v1483_v61 = vadd.f32 %v1467_v10, %v1946_v12  ;;  %v1468_v2 = vmul.f32 %v2251_v9, %v1440_v58 }
 0x358   : > { %1499 = vst.msk [vmem:[%s2259_s14 + $0x20] sm:$0xff] %vm289_vm0, %v1483_v61  ;;  %v1484_v11 = vadd.f32 %v1468_v2, %v1949_v13  ;;  %v1852_v21 = vpop.eup %1851 }
 0x359   : > { %v1246_v62 = vpop.f32.mrb[44].mxu1 }
 0x35a   : > { %1500 = vst.msk [vmem:[%s2259_s14 + $0x28] sm:$0xff] %vm289_vm0, %v1484_v11  ;;  %v1442_v0 = vmul.f32 %v1836_v50, %v1246_v62  ;;  %v1746_v15 = vpop.f32.mrb[45].mxu1  ;;  %v1854_v11 = vpop.eup %1853 }
 0x35b   : > { %v1249_v1 = vpop.f32.mrb[46].mxu1 }
 0x35c   : > { %v1469_v12 = vmul.f32 %v2251_v9, %v1442_v0  ;;  %v1444_v4 = vmul.f32 %v1838_v31, %v1249_v1  ;;  %v1747_v6 = vpop.f32.mrb[47].mxu1 }
 0x35e   : > { %v1485_v5 = vadd.f32 %v1469_v12, %v1961_v16  ;;  %v1470_v13 = vmul.f32 %v2251_v9, %v1444_v4 }
 0x360   : > { %1501 = vst.msk [vmem:[%s2259_s14 + $0x30] sm:$0xff] %vm289_vm0, %v1485_v5  ;;  %v1486_v41 = vadd.f32 %v1470_v13, %v1964_v17 }
 0x361   : > { %v1290_v26 = vpop.f32.mrb[48].mxu0 }
 0x362   : > { %1502 = vst.msk [vmem:[%s2259_s14 + $0x38] sm:$0xff] %vm289_vm0, %v1486_v41  ;;  %v1446_v32 = vmul.f32 %v1840_v30, %v1290_v26  ;;  %v1752_v38 = vpop.f32.mrb[49].mxu0 }
 0x363   : > { %v1293_v45 = vpop.f32.mrb[50].mxu0 }
 0x364   : > { %v1471_v16 = vmul.f32 %v2251_v9, %v1446_v32  ;;  %v1448_v35 = vmul.f32 %v1842_v33, %v1293_v45  ;;  %v1753_v20 = vpop.f32.mrb[51].mxu0 }
 0x366   : > { %v1487_v40 = vadd.f32 %v1471_v16, %v1967_v18  ;;  %v1472_v17 = vmul.f32 %v2251_v9, %v1448_v35 }
 0x368   : > { %1503 = vst.msk [vmem:[%s2259_s14 + $0x40] sm:$0xff] %vm289_vm0, %v1487_v40  ;;  %v1488_v14 = vadd.f32 %v1472_v17, %v1970_v19 }
 0x369   : > { %v1334_v43 = vpop.f32.mrb[48].mxu1 }
 0x36a   : > { %1504 = vst.msk [vmem:[%s2259_s14 + $0x48] sm:$0xff] %vm289_vm0, %v1488_v14  ;;  %v1450_v47 = vmul.f32 %v1844_v34, %v1334_v43  ;;  %v1758_v52 = vpop.f32.mrb[49].mxu1 }
 0x36b   : > { %v1337_v42 = vpop.f32.mrb[50].mxu1 }
 0x36c   : > { %v1473_v18 = vmul.f32 %v2251_v9, %v1450_v47  ;;  %v1452_v7 = vmul.f32 %v1846_v55, %v1337_v42  ;;  %v1759_v60 = vpop.f32.mrb[51].mxu1 }
 0x36e   : > { %v1489_v48 = vadd.f32 %v1473_v18, %v1981_v22  ;;  %v1474_v19 = vmul.f32 %v2251_v9, %v1452_v7 }
 0x370   : > { %1505 = vst.msk [vmem:[%s2259_s14 + $0x50] sm:$0xff] %vm289_vm0, %v1489_v48  ;;  %v1490_v8 = vadd.f32 %v1474_v19, %v1984_v23 }
 0x371   : > { %v1378_v51 = vpop.f32.mrb[52].mxu0 }
 0x372   : > { %1506 = vst.msk [vmem:[%s2259_s14 + $0x58] sm:$0xff] %vm289_vm0, %v1490_v8  ;;  %v1454_v44 = vmul.f32 %v1848_v49, %v1378_v51  ;;  %v1764_v53 = vpop.f32.mrb[53].mxu0 }
 0x373   : > { %v1381_v57 = vpop.f32.mrb[54].mxu0 }
 0x374   : > { %v1475_v22 = vmul.f32 %v2251_v9, %v1454_v44  ;;  %v1456_v59 = vmul.f32 %v1850_v54, %v1381_v57  ;;  %v1765_v27 = vpop.f32.mrb[55].mxu0 }
 0x376   : > { %v1491_v10 = vadd.f32 %v1475_v22, %v1987_v24  ;;  %v1476_v58 = vmul.f32 %v2251_v9, %v1456_v59 }
 0x378   : > { %1507 = vst.msk [vmem:[%s2259_s14 + $0x60] sm:$0xff] %vm289_vm0, %v1491_v10  ;;  %v1492_v23 = vadd.f32 %v1476_v58, %v1990_v25 }
 0x379   : > { %v1422_v63 = vpop.f32.mrb[52].mxu1 }
 0x37a   : > { %1508 = vst.msk [vmem:[%s2259_s14 + $0x68] sm:$0xff] %vm289_vm0, %v1492_v23  ;;  %v1458_v61 = vmul.f32 %v1852_v21, %v1422_v63  ;;  %v1770_v2 = vpop.f32.mrb[53].mxu1 }
 0x37b   : > { %v1425_v50 = vpop.f32.mrb[54].mxu1 }
 0x37c   : > { %v1477_v62 = vmul.f32 %v2251_v9, %v1458_v61  ;;  %v1460_v0 = vmul.f32 %v1854_v11, %v1425_v50  ;;  %v1771_v24 = vpop.f32.mrb[55].mxu1 }
 0x37e   : > { %v1493_v15 = vadd.f32 %v1477_v62, %v2001_v28  ;;  %v1478_v31 = vmul.f32 %v2251_v9, %v1460_v0 }
 0x380   : > { %1509 = vst.msk [vmem:[%s2259_s14 + $0x70] sm:$0xff] %vm289_vm0, %v1493_v15  ;;  %v1494_v25 = vadd.f32 %v1478_v31, %v2004_v29 }
 0x382   : > { %1510 = vst.msk [vmem:[%s2259_s14 + $0x78] sm:$0xff] %vm289_vm0, %v1494_v25 }
 0x383 PF: > { %s15_s17 = sadd.s32 1, %s1861_s17  }
 0x384   : > { %p12_p4 = scmp.ge.s32.totalorder %s15_s17, 6  }
 0x386   :  { %14 = sbr.rel (!%p12_p4) target bundleno = 2 (0x2), region = 66 }

</bundles_post_ra>
